<compile_context>
chip_gen: v7x
topology: tpu7x:2x2x1
jax: 0.10.0
libtpu: 0.0.40
codegen_flags: <defaults>
</compile_context>

<pallas_src>
import functools

import jax
import jax.numpy as jnp
from jax import lax
from jax.experimental import pallas as pl
from jax.experimental.pallas import tpu as pltpu

LANE = 128
SUBLANE = 8
NUM_SHARDS = 2  # leading "parallel" axis: 2 TCs on v7x, harmless elsewhere


def dice_kernel(p_ref, t_ref, out_ref, *, block_rows, blocks_per_shard,
                full_rows, tail_lanes):
    c = pl.program_id(0)   # shard (parallel axis)
    i = pl.program_id(1)   # row-block within shard (reduction axis)

    @pl.when(i == 0)
    def _init():
        out_ref[...] = jnp.zeros_like(out_ref)

    # Unclamped global row offset of this tile -> validity mask. This handles
    # both the ragged tail of the input and the clamped duplicate blocks of a
    # shard that has fewer real blocks than grid steps.
    row0 = (c * blocks_per_shard + i) * block_rows
    row_ids = row0 + lax.broadcasted_iota(jnp.int32, (block_rows, LANE), 0)
    if tail_lanes:
        lane_ids = lax.broadcasted_iota(jnp.int32, (block_rows, LANE), 1)
        valid = (row_ids < full_rows) | ((row_ids == full_rows) &
                                         (lane_ids < tail_lanes))
    else:
        valid = row_ids < full_rows

    # Cast to f32 inside the kernel (inputs stay in their original dtype in HBM).
    p = jax.nn.sigmoid(p_ref[...].astype(jnp.float32))
    t = t_ref[...].astype(jnp.float32)

    pt = jnp.where(valid, p * t, 0.0)   # intersection terms
    s = jnp.where(valid, p + t, 0.0)    # union terms: sum(p)+sum(t) == sum(p+t)

    # Reduce the tile to a fixed (8, LANE) partial so the accumulator does not
    # scale with the tile size (pure vreg-wise VPU adds; layout-preserving reshape).
    pt_red = jnp.sum(pt.reshape(block_rows // SUBLANE, SUBLANE, LANE), axis=0)
    s_red = jnp.sum(s.reshape(block_rows // SUBLANE, SUBLANE, LANE), axis=0)

    out_ref[0, 0] += pt_red
    out_ref[0, 1] += s_red


def dice_loss(preds, targets, smooth=1e-6, block_rows=1024):
    """Pallas implementation of DiceLoss.forward (returns a scalar f32)."""
    n = preds.size
    p_flat = preds.reshape(-1)
    t_flat = targets.reshape(-1)

    # Minimal pad (only when the element count is not a multiple of 8*128);
    # padded elements are masked out in-kernel, so the pad value is irrelevant
    # and the inputs keep their original dtype.
    align = SUBLANE * LANE
    rem = n % align
    if rem:
        pad = align - rem
        p_flat = jnp.pad(p_flat, (0, pad))
        t_flat = jnp.pad(t_flat, (0, pad))

    n_rows = p_flat.size // LANE
    p2d = p_flat.reshape(n_rows, LANE)
    t2d = t_flat.reshape(n_rows, LANE)

    # Tile sizing: large tiles for HBM-bound workload, capped to the data and
    # kept a multiple of the sublane count. 1024 rows = 512 KiB f32 per input
    # tile; double-buffered x 2 inputs stays well inside every chip's VMEM.
    block_rows = min(block_rows, n_rows)
    block_rows = max(SUBLANE, (block_rows // SUBLANE) * SUBLANE)
    n_blocks = pl.cdiv(n_rows, block_rows)
    blocks_per_shard = pl.cdiv(n_blocks, NUM_SHARDS)
    grid = (NUM_SHARDS, blocks_per_shard)

    def in_index_map(c, i):
        g = c * blocks_per_shard + i
        return (jnp.minimum(g, n_blocks - 1), 0)

    kernel = functools.partial(
        dice_kernel,
        block_rows=block_rows,
        blocks_per_shard=blocks_per_shard,
        full_rows=n // LANE,
        tail_lanes=n % LANE,
    )

    partials = pl.pallas_call(
        kernel,
        out_shape=jax.ShapeDtypeStruct((NUM_SHARDS, 2, SUBLANE, LANE),
                                       jnp.float32),
        grid_spec=pltpu.PrefetchScalarGridSpec(
            num_scalar_prefetch=0,
            grid=grid,
            in_specs=[
                pl.BlockSpec((block_rows, LANE), in_index_map),
                pl.BlockSpec((block_rows, LANE), in_index_map),
            ],
            out_specs=pl.BlockSpec((1, 2, SUBLANE, LANE),
                                   lambda c, i: (c, 0, 0, 0)),
        ),
        compiler_params=pltpu.CompilerParams(
            dimension_semantics=("parallel", "arbitrary"),
            vmem_limit_bytes=32 * 1024 * 1024,
        ),
    )(p2d, t2d)

    # Tiny final combine in JAX: (2, 2, 8, 128) partials -> scalar.
    intersection = jnp.sum(partials[:, 0])
    union = jnp.sum(partials[:, 1])
    dice = (2.0 * intersection + float(smooth)) / (union + float(smooth))
    return (1.0 - dice).astype(jnp.float32)


def dice_loss_ref(preds, targets, smooth=1e-6):
    p = jax.nn.sigmoid(preds.astype(jnp.float32)).reshape(-1)
    t = targets.astype(jnp.float32).reshape(-1)
    intersection = jnp.sum(p * t)
    union = jnp.sum(p) + jnp.sum(t)
    dice = (2.0 * intersection + smooth) / (union + smooth)
    return 1.0 - dice


if __name__ == "__main__":
    key = jax.random.PRNGKey(0)
    k1, k2 = jax.random.split(key)

    # Small NCHW-shaped segmentation logits + binary targets.
    preds = jax.random.normal(k1, (2, 4, 16, 16), dtype=jnp.float32)
    targets = (jax.random.uniform(k2, (2, 4, 16, 16)) > 0.5).astype(jnp.float32)

    loss = dice_loss(preds, targets)
    loss = jax.block_until_ready(loss)

    ref = dice_loss_ref(preds, targets)
    assert jnp.allclose(loss, ref, rtol=1e-5, atol=1e-6), (loss, ref)

    print("KERNEL_OK")
</pallas_src>

<mosaic_0001>
module attributes {stable_mosaic.version = 11 : i64} {
  func.func @dice_kernel(%arg0: i32, %arg1: i32, %arg2: memref<16x128xf32, #tpu.memory_space<vmem>>, %arg3: memref<16x128xf32, #tpu.memory_space<vmem>>, %arg4: memref<1x2x8x128xf32, #tpu.memory_space<vmem>>) attributes {dimension_semantics = [#tpu.dimension_semantics<parallel>, #tpu.dimension_semantics<arbitrary>], iteration_bounds = array<i64: 2, 1>, scalar_prefetch = 0 : i64, scratch_operands = 0 : i64, tpu.core_type = #tpu.core_type<tc>, window_params = [{transform_indices = @transform_0, window_bounds = array<i64: 16, 128>}, {transform_indices = @transform_1, window_bounds = array<i64: 16, 128>}, {transform_indices = @transform_2, window_bounds = array<i64: 1, 2, 8, 128>}]} {
    %c0_i32 = arith.constant 0 : i32
    %0 = arith.cmpi eq, %arg1, %c0_i32 : i32
    %1 = arith.extui %0 : i1 to i32
    %c0_i32_0 = arith.constant 0 : i32
    %2 = arith.cmpi ne, %1, %c0_i32_0 : i32
    scf.if %2 {
      %cst_24 = arith.constant 0.000000e+00 : f32
      %40 = vector.broadcast %cst_24 : f32 to vector<1x2x8x128xf32>
      %c0_25 = arith.constant 0 : index
      %c0_26 = arith.constant 0 : index
      %c0_27 = arith.constant 0 : index
      %c0_28 = arith.constant 0 : index
      %41 = vector.load %arg4[%c0_25, %c0_26, %c0_27, %c0_28] : memref<1x2x8x128xf32, #tpu.memory_space<vmem>>, vector<1x2x8x128xf32>
      tpu.vector_store %arg4[%c0_25, %c0_26, %c0_27, %c0_28], %40 {strides = array<i32>} : memref<1x2x8x128xf32, #tpu.memory_space<vmem>>, vector<1x2x8x128xf32>,
    } else {
    }
    %c1_i32 = arith.constant 1 : i32
    %3 = arith.muli %arg0, %c1_i32 : i32
    %4 = arith.addi %3, %arg1 : i32
    %c16_i32 = arith.constant 16 : i32
    %5 = arith.muli %4, %c16_i32 : i32
    %6 = tpu.iota {dimensions = array<i32: 0>} : vector<16x128xi32>
    %7 = vector.broadcast %5 : i32 to vector<16x128xi32>
    %8 = arith.addi %7, %6 : vector<16x128xi32>
    %c16_i32_1 = arith.constant 16 : i32
    %9 = vector.broadcast %c16_i32_1 : i32 to vector<16x128xi32>
    %10 = arith.cmpi slt, %8, %9 : vector<16x128xi32>
    %c0 = arith.constant 0 : index
    %c0_2 = arith.constant 0 : index
    %11 = vector.load %arg2[%c0, %c0_2] : memref<16x128xf32, #tpu.memory_space<vmem>>, vector<16x128xf32>
    %12 = arith.negf %11 : vector<16x128xf32>
    %13 = math.exp %12 : vector<16x128xf32>
    %cst = arith.constant 1.000000e+00 : f32
    %14 = vector.broadcast %cst : f32 to vector<16x128xf32>
    %15 = arith.addf %14, %13 : vector<16x128xf32>
    %16 = arith.divf %14, %15 : vector<16x128xf32>
    %c0_3 = arith.constant 0 : index
    %c0_4 = arith.constant 0 : index
    %17 = vector.load %arg3[%c0_3, %c0_4] : memref<16x128xf32, #tpu.memory_space<vmem>>, vector<16x128xf32>
    %18 = arith.mulf %16, %17 : vector<16x128xf32>
    %cst_5 = arith.constant 0.000000e+00 : f32
    %19 = vector.broadcast %cst_5 : f32 to vector<16x128xf32>
    %20 = arith.select %10, %18, %19 : vector<16x128xi1>, vector<16x128xf32>
    %21 = arith.addf %16, %17 : vector<16x128xf32>
    %cst_6 = arith.constant 0.000000e+00 : f32
    %22 = vector.broadcast %cst_6 : f32 to vector<16x128xf32>
    %23 = arith.select %10, %21, %22 : vector<16x128xi1>, vector<16x128xf32>
    %24 = vector.shape_cast %20 : vector<16x128xf32> to vector<2x8x128xf32>
    %cst_7 = arith.constant dense<0.000000e+00> : vector<8x128xf32>
    %25 = vector.multi_reduction <add>, %24, %cst_7 [0] : vector<2x8x128xf32> to vector<8x128xf32>
    %26 = vector.shape_cast %23 : vector<16x128xf32> to vector<2x8x128xf32>
    %cst_8 = arith.constant dense<0.000000e+00> : vector<8x128xf32>
    %27 = vector.multi_reduction <add>, %26, %cst_8 [0] : vector<2x8x128xf32> to vector<8x128xf32>
    %c0_9 = arith.constant 0 : index
    %c0_10 = arith.constant 0 : index
    %c0_11 = arith.constant 0 : index
    %c0_12 = arith.constant 0 : index
    %28 = vector.load %arg4[%c0_9, %c0_10, %c0_11, %c0_12] : memref<1x2x8x128xf32, #tpu.memory_space<vmem>>, vector<1x1x8x128xf32>
    %29 = vector.shape_cast %28 : vector<1x1x8x128xf32> to vector<8x128xf32>
    %30 = arith.addf %29, %25 : vector<8x128xf32>
    %c0_13 = arith.constant 0 : index
    %c0_14 = arith.constant 0 : index
    %c0_15 = arith.constant 0 : index
    %c0_16 = arith.constant 0 : index
    %31 = vector.load %arg4[%c0_13, %c0_14, %c0_15, %c0_16] : memref<1x2x8x128xf32, #tpu.memory_space<vmem>>, vector<1x1x8x128xf32>
    %32 = vector.shape_cast %31 : vector<1x1x8x128xf32> to vector<8x128xf32>
    %33 = vector.shape_cast %30 : vector<8x128xf32> to vector<1x1x8x128xf32>
    tpu.vector_store %arg4[%c0_13, %c0_14, %c0_15, %c0_16], %33 {strides = array<i32>} : memref<1x2x8x128xf32, #tpu.memory_space<vmem>>, vector<1x1x8x128xf32>,
    %c0_17 = arith.constant 0 : index
    %c1 = arith.constant 1 : index
    %c0_18 = arith.constant 0 : index
    %c0_19 = arith.constant 0 : index
    %34 = vector.load %arg4[%c0_17, %c1, %c0_18, %c0_19] : memref<1x2x8x128xf32, #tpu.memory_space<vmem>>, vector<1x1x8x128xf32>
    %35 = vector.shape_cast %34 : vector<1x1x8x128xf32> to vector<8x128xf32>
    %36 = arith.addf %35, %27 : vector<8x128xf32>
    %c0_20 = arith.constant 0 : index
    %c1_21 = arith.constant 1 : index
    %c0_22 = arith.constant 0 : index
    %c0_23 = arith.constant 0 : index
    %37 = vector.load %arg4[%c0_20, %c1_21, %c0_22, %c0_23] : memref<1x2x8x128xf32, #tpu.memory_space<vmem>>, vector<1x1x8x128xf32>
    %38 = vector.shape_cast %37 : vector<1x1x8x128xf32> to vector<8x128xf32>
    %39 = vector.shape_cast %36 : vector<8x128xf32> to vector<1x1x8x128xf32>
    tpu.vector_store %arg4[%c0_20, %c1_21, %c0_22, %c0_23], %39 {strides = array<i32>} : memref<1x2x8x128xf32, #tpu.memory_space<vmem>>, vector<1x1x8x128xf32>,
    return
  }
  func.func @transform_0(%arg0: i32, %arg1: i32) -> (i32, i32) {
    %c1_i32 = arith.constant 1 : i32
    %0 = arith.muli %arg0, %c1_i32 : i32
    %1 = arith.addi %0, %arg1 : i32
    %c0_i32 = arith.constant 0 : i32
    %2 = arith.minsi %1, %c0_i32 : i32
    %c0_i32_0 = arith.constant 0 : i32
    %c0_i32_1 = arith.constant 0 : i32
    return %2, %c0_i32_0 : i32, i32
  }
  func.func @transform_1(%arg0: i32, %arg1: i32) -> (i32, i32) {
    %c1_i32 = arith.constant 1 : i32
    %0 = arith.muli %arg0, %c1_i32 : i32
    %1 = arith.addi %0, %arg1 : i32
    %c0_i32 = arith.constant 0 : i32
    %2 = arith.minsi %1, %c0_i32 : i32
    %c0_i32_0 = arith.constant 0 : i32
    %c0_i32_1 = arith.constant 0 : i32
    return %2, %c0_i32_0 : i32, i32
  }
  func.func @transform_2(%arg0: i32, %arg1: i32) -> (i32, i32, i32, i32) {
    %c0_i32 = arith.constant 0 : i32
    %c0_i32_0 = arith.constant 0 : i32
    %c0_i32_1 = arith.constant 0 : i32
    %c0_i32_2 = arith.constant 0 : i32
    return %arg0, %c0_i32, %c0_i32_0, %c0_i32_1 : i32, i32, i32, i32
  }
}

</mosaic_0001>

<bundles_post_ra>
// kernel: tpu_custom_call.1
= control target key start
LH: loop header
LB: loop body
LE: loop exit
PB: predicated region body
PF: predicated region fallthrough
CT: control target
= control target key end

     0   :  { %7 = vsyncpa [#allocation3], 0  ;;  %s936_s0 = inlined_call_operand.hbm [shape: f32[16,128], index: 0, kind: input, shape index: {}]   ;;  %s937_s1 = inlined_call_operand.hbm [shape: f32[16,128], index: 1, kind: input, shape index: {}]   ;;  %s938_s2 = inlined_call_operand.hbm [shape: f32[2,2,8,128], index: 2, kind: output, shape index: {}]  }
   0x1   :  { %9 = vsyncpa [#allocation3 + $0x1], 0 }
   0x2   :  { %10 = vsyncpa [#allocation6], 0 }
   0x3   :  { %12 = vsyncpa [#allocation6 + $0x1], 0 }
   0x4   :  { %13 = vsyncpa [#allocation4], 0 }
   0x5   :  { %15 = vsyncpa [#allocation4 + $0x1], 0  ;;  %s729_s9 = smov 0   ;;  %s731_s10 = smov 0  }
   0x6   :  { %s733_s11 = smov 0   ;;  %s735_s12 = smov 0  }
   0x7   :  { %s737_s13 = smov 0   ;;  %s739_s14 = smov 0  }
   0x8   :  { %s741_s15 = smov 0   ;;  %s743_s16 = smov 0  }
   0x9 LB: > { %s407_s17 = sadd.s32 4294967295, %s705_s16   ;;  %s408_s18 = sadd.s32 4294967294, %s705_s16   ;;  %s705_s16 = sphi %s743_s16, %s21_s16   ;;  %s701_s15 = sphi %s741_s15, %s957_s15   ;;  %s697_s14 = sphi %s739_s14, %s956_s14   ;;  %s693_s13 = sphi %s737_s13, %s926_s13   ;;  %s689_s12 = sphi %s735_s12, %s955_s12   ;;  %s685_s11 = sphi %s733_s11, %s954_s11   ;;  %s681_s10 = sphi %s731_s10, %s953_s10   ;;  %s677_s9 = sphi %s729_s9, %s952_s9  }
   0xa   : > { %s33_s19 = sadd.s32 1, %s701_s15  ;;  %p674_p1 = scmp.ne.s32.totalorder %s693_s13, 0 }
   0xb   : > { %p35_p0 = scmp.ge.s32.totalorder %s33_s19, 2  ;;  %p54_p2 = scmp.eq.s32.totalorder %s705_s16, 0 }
   0xc   : > { %p59_p3 = scmp.ne.s32.totalorder %s693_s13, %s689_s12  ;;  %p60_p5 = scmp.eq.s32.totalorder %s407_s17, 0 }
   0xd   : > { %s959_s19 = smov (%p35_p0, %s33_s19), 0  ;;  %p775_p4 = por %p674_p1, %p54_p2 }
   0xe   : > { %p779_p6 = por %p60_p5, %p59_p3  ;;  %s101_s22 = ssub.s32 %s701_s15, %s959_s19 }
   0xf   : > { %p102_p7 = scmp.eq.s32.totalorder %s101_s22, 0  ;;  %s104_s23 = sadd.s32 1, %s685_s11 }
  0x10   : > { %s942_s21 = scalar_select %p779_p6, 1, 0 }
  0x11   : > { %s787_s24 = scalar_select %p102_p7, %s685_s11, %s104_s23  }
  0x12   : > { %p114_p8 = scmp.ne.s32.totalorder %s685_s11, %s681_s10  ;;  %p115_p9 = scmp.eq.s32.totalorder %s407_s17, 1 }
  0x13   : > { %p120_p10 = scmp.ne.s32.totalorder %s681_s10, %s677_s9  ;;  %p121_p11 = scmp.eq.s32.totalorder %s408_s18, 1 }
  0x14   : > { %p793_p12 = por %p115_p9, %p114_p8  ;;  %p451_p1 = scmp.lt.s32.totalorder %s705_s16, 2 }
  0x15   : > { %p798_p0 = por %p121_p11, %p120_p10  ;;  %s707_s27 = smov [#allocation2]  }
  0x16   : > { %s943_s25 = scalar_select %p793_p12, 1, 0 }
  0x17   : > { %s944_s26 = scalar_select %p798_p0, 1, 0 }
  0x18   : > { %s155_s28 = sshll.u32 %s707_s27, 4  ;;  %p805_p2 = pnand %p451_p1, %p775_p4  ;;  %s156_s28 = int_to_ptr.vmem [resolvable:$true] %s155_s28 }
  0x19   : > { %s538_s4 = scalar_lea.hbm %s936_s0, 256 }
  0x1a   : > { %p539_p3 = scmp.ne.s32.totalorder %s936_s0, %s538_s4  ;;  %p540_p5 = pneg %p805_p2 }
  0x1b   : > { %p545_p8 = scmp.lt.u32.totalorder %s538_s4, %s538_s4  ;;  %p547_p9 = scmp.lt.u32.totalorder %s538_s4, %s936_s0 }
  0x1c   : > { %p541_p7 = pnand %p540_p5, %p539_p3 }
  0x1d   : > { %p548_p10 = por %p547_p9, %p545_p8 }
  0x1e   : > { %p542_p4 = pneg %p541_p7 }
  0x20   : > { %p549_p11 = pnand %p548_p10, %p542_p4 }
  0x22   : > { %552 = shalt.err (!%p549_p11)
}
  0x23   : > { %s553_s12 = scalar_lea.vmem %s156_s28, 256  ;;  %s560_s17 = scalar_lea.vmem %s156_s28, 512 }
  0x24   : > { %p554_p1 = scmp.ne.s32.totalorder %s156_s28, %s553_s12  ;;  %p561_p12 = scmp.lt.s32.totalorder %s156_s28, %s156_s28 }
  0x25   : > { %p562_p6 = scmp.lt.s32.totalorder %s560_s17, %s553_s12 }
  0x26   : > { %p556_p13 = pnand %p554_p1, %p540_p5 }
  0x27   : > { %p563_p3 = por %p562_p6, %p561_p12 }
  0x28   : > { %p557_p0 = pneg %p556_p13 }
  0x2a   : > { %p564_p7 = pnand %p563_p3, %p557_p0 }
  0x2c   : > { %567 = shalt.err (!%p564_p7)
}
  0x2d   : > { %s708_s18 = smov 128   ;;  %s709_s20 = smov 8  }
  0x2e   : > { %443 = dma.hbm_to_vmem [thread:$0]  (!%p805_p2), %s936_s0, 256, %s156_s28, [#allocation3], %s708_s18, %s708_s18, %s709_s20  }
  0x2f   : > { %p417_p13 = scmp.ge.s32.totalorder %s705_s16, 1  ;;  %p187_p4 = scmp.lt.s32.totalorder %s705_s16, 3 }
  0x30   : > { %s710_s30 = smov [#allocation5]   ;;  %s568_s6 = scalar_lea.hbm %s937_s1, 256 }
  0x31   : > { %p836_p8 = pnand %p417_p13, %p187_p4  ;;  %s179_s3 = sshll.u32 %s710_s30, 4  ;;  %s180_s3 = int_to_ptr.vmem [resolvable:$true] %s179_s3 }
  0x32   : > { %p569_p6 = scmp.ne.s32.totalorder %s937_s1, %s568_s6  ;;  %p575_p9 = scmp.lt.u32.totalorder %s568_s6, %s568_s6 }
  0x33   : > { %s946_s27 = scalar_select %p836_p8, 1, 0 }
  0x34   : > { %p571_p12 = pnand %p569_p6, %p540_p5  ;;  %p577_p10 = scmp.lt.u32.totalorder %s568_s6, %s937_s1 }
  0x36   : > { %p572_p0 = pneg %p571_p12  ;;  %p578_p11 = por %p577_p10, %p575_p9 }
  0x38   : > { %p579_p1 = pnand %p578_p11, %p572_p0 }
  0x3a   : > { %582 = shalt.err (!%p579_p1)
}
  0x3b   : > { %s583_s17 = scalar_lea.vmem %s180_s3, 256  ;;  %s590_s22 = scalar_lea.vmem %s180_s3, 512 }
  0x3c   : > { %p584_p3 = scmp.ne.s32.totalorder %s180_s3, %s583_s17  ;;  %p591_p4 = scmp.lt.s32.totalorder %s180_s3, %s180_s3 }
  0x3d   : > { %p592_p8 = scmp.lt.s32.totalorder %s590_s22, %s583_s17 }
  0x3e   : > { %p586_p7 = pnand %p584_p3, %p540_p5 }
  0x3f   : > { %p593_p6 = por %p592_p8, %p591_p4 }
  0x40   : > { %p587_p13 = pneg %p586_p7 }
  0x42   : > { %p594_p12 = pnand %p593_p6, %p587_p13 }
  0x44   : > { %597 = shalt.err (!%p594_p12)
}
  0x45   : > { %446 = dma.hbm_to_vmem [thread:$0]  (!%p805_p2), %s937_s1, 256, %s180_s3, [#allocation6], %s708_s18, %s708_s18, %s709_s20  }
  0x46   : > { %p947_p0 = scmp.ne.s32.totalorder %s946_s27, 0 }
  0x47   : > { %s193_s4 = sand.u32 (!%p947_p0), 1, %s693_s13   ;;  %p948_p5 = scmp.ne.s32.totalorder (!%p947_p0), %s942_s21, 0 }
  0x48   : > { %191 = sbr.rel (%p947_p0) target bundleno = 130 (0x82), region = 28  ;;  %s418_s5 = sshll.u32 (!%p947_p0), %s193_s4, 4 }
  0x49   : > { %s194_s6 = scalar_lea.sflag (!%p947_p0), [#allocation3], %s193_s4  ;;  %s197_s7 = scalar_lea.vmem (!%p947_p0), [#allocation2], %s418_s5 }
  0x4f   : > { %663 = dma.done.wait (%p948_p5), %s194_s6, 256  }
  0x50   : > { %665 = vsyncadd (%p948_p5), %s194_s6, 4294967040  ;;  %s203_s29 = scalar_lea.sflag [#allocation6], %s193_s4  ;;  %s206_s8 = scalar_lea.vmem [#allocation5], %s418_s5 }
  0x51   : > { %667 = dma.done.wait (%p948_p5), %s203_s29, 256  }
  0x52   : > { %669 = vsyncadd (%p948_p5), %s203_s29, 4294967040  ;;  %v256_v0 = vld [vmem:[%s197_s7] sm:$0xff]  ;;  %v257_v1 = vld [vmem:[%s197_s7 + $0x8] sm:$0xff]  ;;  %v248_v4 = vlaneseq  ;;  %s421_s18 = sshll.u32 %s697_s14, 4  ;;  %s229_s21 = sand.u32 1, %s681_s10  }
  0x53   : > { %v422_v2 = vmul.f32 -1.442695, %v256_v0  ;;  %v423_v3 = vmul.f32 -1.442695, %v257_v1  ;;  %v251_v11 = vstv %s421_s18  ;;  %s420_s20 = sshll.u32 %s229_s21, 4  ;;  %v270_v14 = vld [vmem:[%s206_s8] sm:$0xff] }
  0x54   : > { %v249_v8 = vshrl.u32 %v248_v4, 7  ;;  %v271_v15 = vld [vmem:[%s206_s8 + $0x8] sm:$0xff]  ;;  %s433_s27 = sshll.u32 %s697_s14, 8  ;;  %s231_s3 = scalar_lea.vmem [#allocation7], %s420_s20 }
  0x55   : > { %530 = vpow2.f32 %v422_v2  ;;  %s303_s28 = sshll.u32 %s231_s3, 4  ;;  %s880_s22 = scalar_lea.hbm %s938_s2, %s433_s27  ;;  %s882_s28 = int_to_ptr.vmem [resolvable:$true] %s303_s28 }
  0x56   : > { %532 = vpow2.f32 %v423_v3  ;;  %v250_v10 = vadd.s32 8, %v249_v8  ;;  %v252_v12 = vadd.s32 %v251_v11, %v249_v8  ;;  %s884_s23 = scalar_lea.sflag [#allocation4], %s229_s21  ;;  %s598_s14 = scalar_lea.vmem %s882_s28, 256 }
  0x57   : > { %p599_p2 = scmp.ne.s32.totalorder %s882_s28, %s598_s14  ;;  %p949_p8 = scmp.ne.s32.totalorder %s943_s25, 0 }
  0x58   : > { %v253_v13 = vadd.s32 %v251_v11, %v250_v10  ;;  %vm254_vm0 = vcmp.lt.s32.totalorder %v252_v12, 16  ;;  %s711_s30 = smov [#allocation7]  }
  0x59   : > { %p600_p9 = pnand %p599_p2, %p949_p8  ;;  %s602_s4 = sshll.u32 %s711_s30, 4  ;;  %s603_s4 = int_to_ptr.vmem [resolvable:$false] %s602_s4 }
  0x5a   : > { %vm255_vm1 = vcmp.lt.s32.totalorder %v253_v13, 16  ;;  %s604_s5 = scalar_lea.vmem %s603_s4, 512  ;;  %p605_p11 = scmp.lt.s32.totalorder %s882_s28, %s603_s4 }
  0x5b   : > { %p601_p10 = pneg %p600_p9  ;;  %p606_p1 = scmp.lt.s32.totalorder %s604_s5, %s598_s14 }
  0x5d   : > { %p607_p3 = por %p606_p1, %p605_p11 }
  0x5f   : > { %v531_v5 = vpop.eup %530  ;;  %p608_p7 = pnand %p607_p3, %p601_p10 }
  0x60   : > { %v533_v6 = vpop.eup %532  ;;  %v264_v7 = vadd.f32 1.0, %v531_v5 }
  0x61   : > { %v265_v9 = vadd.f32 1.0, %v533_v6 }
  0x62   : > { %534 = vrcp.f32 %v264_v7 }
  0x63   : > { %536 = vrcp.f32 %v265_v9 }
  0x6c   : > { %v535_v16 = vpop.eup %534 }
  0x6d   : > { %v537_v17 = vpop.eup %536  ;;  %v272_v18 = vmul.f32 %v535_v16, %v270_v14  ;;  %v276_v19 = vadd.f32 %v535_v16, %v270_v14 }
  0x6e   : > { %v273_v20 = vmul.f32 %v537_v17, %v271_v15  ;;  %v277_v21 = vadd.f32 %v537_v17, %v271_v15 }
  0x6f   : > { %v274_v22 = vsel %vm254_vm0, %v272_v18, 0.0  ;;  %v278_v23 = vsel %vm254_vm0, %v276_v19, 0.0 }
  0x70   : > { %v275_v24 = vsel %vm255_vm1, %v273_v20, 0.0  ;;  %v279_v25 = vsel %vm255_vm1, %v277_v21, 0.0 }
  0x71   : > { %v280_v26 = vadd.f32 %v275_v24, %v274_v22  ;;  %v281_v27 = vadd.f32 %v279_v25, %v278_v23 }
  0x73   : > { %284 = vst [vmem:[%s231_s3] sm:$0xff] %v280_v26  ;;  %425 = vst [vmem:[%s231_s3 + $0x8] sm:$0xff] %v281_v27 }
  0x74   : > { %611 = shalt.err (!%p608_p7)
}
  0x75   : > { %s612_s6 = scalar_lea.hbm %s880_s22, 256  ;;  %s616_s8 = scalar_lea.hbm %s938_s2, 512 }
  0x76   : > { %p613_p13 = scmp.ne.s32.totalorder %s880_s22, %s612_s6  ;;  %p617_p12 = scmp.lt.u32.totalorder %s880_s22, %s938_s2 }
  0x77   : > { %p618_p0 = scmp.lt.u32.totalorder %s616_s8, %s612_s6  ;;  %p620_p2 = scmp.lt.u32.totalorder %s612_s6, %s880_s22 }
  0x78   : > { %p614_p4 = pnand %p613_p13, %p949_p8 }
  0x79   : > { %p619_p5 = por %p618_p0, %p617_p12 }
  0x7a   : > { %p615_p6 = pneg %p614_p4 }
  0x7b   : > { %p621_p9 = por %p620_p2, %p619_p5 }
  0x7d   : > { %p622_p10 = pnand %p621_p9, %p615_p6 }
  0x7f   : > { %625 = shalt.err (!%p622_p10)
}
  0x80   : > { %s712_s20 = smov 128   ;;  %s713_s27 = smov 8  }
  0x81   : > { %438 = dma.vmem_to_hbm [thread:$0]  (%p949_p8), %s882_s28, 256, %s880_s22, %s884_s23, %s712_s20, %s712_s20, %s713_s27  }
  0x82 PF: > { %s318_s3 = sand.u32 1, %s677_s9   ;;  %p950_p11 = scmp.ne.s32.totalorder %s944_s26, 0 }
  0x83   : > { %p951_p1 = scmp.ge.s32.totalorder %s705_s16, 2  ;;  %s319_s12 = scalar_lea.sflag [#allocation4], %s318_s3 }
  0x85   : > { %p448_p3 = pnand %p951_p1, %p950_p11 }
  0x87   : > { %671 = dma.done.wait (!%p448_p3), %s319_s12, 256  }
  0x88   : > { %673 = vsyncadd (!%p448_p3), %s319_s12, 4294967040  ;;  %s21_s16 = sadd.s32 1, %s705_s16   ;;  %s952_s9 = smov %s681_s10 }
  0x89   : > { %p18_p7 = scmp.ge.s32.totalorder %s21_s16, 4   ;;  %s953_s10 = smov %s685_s11 }
  0x8a   : > { %s954_s11 = smov %s787_s24  ;;  %s955_s12 = smov %s693_s13 }
  0x8b   : > { %s926_s13 = smov 0   ;;  %s956_s14 = smov %s701_s15 }
  0x8c   : > { %s957_s15 = smov %s959_s19  ;;  %20 = sbr.rel (!%p18_p7) target bundleno = 9 (0x9), region = 91 }
  0x93   :  { %324 = vsyncpa [#allocation3], 1 }
  0x94   :  { %326 = vsyncpa [#allocation3 + $0x1], 1 }
  0x95   :  { %327 = vsyncpa [#allocation6], 1 }
  0x96   :  { %329 = vsyncpa [#allocation6 + $0x1], 1 }
  0x97   :  { %330 = vsyncpa [#allocation4], 1 }
  0x98   :  { %332 = vsyncpa [#allocation4 + $0x1], 1 }

</bundles_post_ra>
